<compile_context>
chip_gen: v5e
topology: v5e:2x2
jax: 0.10.0
libtpu: 0.0.40
codegen_flags: <defaults>
</compile_context>

<pallas_src>
import functools

import jax
import jax.numpy as jnp
from jax.experimental import pallas as pl
from jax.experimental.pallas import tpu as pltpu


# ----------------------------- helpers --------------------------------------

def _bn_fold(gamma, beta, mean, var, eps=1e-5):
    s = gamma / jnp.sqrt(var + eps)
    b = beta - mean * s
    return s.astype(jnp.float32), b.astype(jnp.float32)


# ----------------------------- forward pass ---------------------------------

def encoder_bottleneck_forward(x_nchw, params, *, compute_dtype=jnp.bfloat16,
                               out_dtype=jnp.float32):
    """EncoderBottleneck.forward (stride=2, base_width=64 => width == out_ch)."""
    B, Cin, H, W = x_nchw.shape
    width = params["conv1_w"].shape[0]
    Cout = params["down_w"].shape[0]
    assert width == Cout, "residual add requires width == out_channels"
    assert H % 2 == 0 and W % 2 == 0, "stride-2 path assumes even spatial dims"
    Ho, Wo = H // 2, W // 2
    n = Ho * Wo
    cd = compute_dtype

    # --- wrapper glue: space-to-depth of x into 4 stride-2 phase planes.
    # xph[b, 2*py+px, c, ho*Wo+wo] = x[b, c, 2*ho+py, 2*wo+px]; same byte count
    # as x (1x), read exactly once by the kernel (was 2.25x tap planes).
    xr = x_nchw.reshape(B, Cin, Ho, 2, Wo, 2)
    xph = jnp.transpose(xr, (0, 3, 5, 1, 2, 4)).reshape(B, 4, Cin, n).astype(cd)

    # col-0 mask: zero where wo == 0 (conv2's left zero padding of h1).
    cmask = (jnp.arange(n, dtype=jnp.int32) % Wo != 0).astype(
        jnp.float32).reshape(1, n)

    # --- fold BatchNorm (inference form) scale into the conv weights.
    s1, b1 = _bn_fold(params["bn1_g"], params["bn1_b"],
                      params["bn1_m"], params["bn1_v"])
    sd, bd = _bn_fold(params["down_g"], params["down_b"],
                      params["down_m"], params["down_v"])
    w1 = (params["conv1_w"].reshape(width, Cin) * s1[:, None]).astype(cd)
    wd = (params["down_w"].reshape(Cout, Cin) * sd[:, None]).astype(cd)
    # w2r[co, t*width + ci] = conv2_w[co, ci, dy, dx], t = 3*dy + dx.
    w2 = jnp.transpose(params["conv2_w"], (0, 2, 3, 1)).reshape(
        width, 9 * width).astype(cd)
    b1c = b1.reshape(width, 1)
    bdc = bd.reshape(Cout, 1)

    # Static per-phase tap plan. Output tap (dy, dx) reads h1[2ho+dy-1, 2wo+dx-1]
    #  = phase(py = dy!=1, px = dx!=1)[ho - (dy==0), wo - (dx==0)]  (0 if OOB).
    # In the flat (Ho*Wo) lane layout that is a zero-filled shift by
    # s = (dy==0)*Wo + (dx==0), plus the col-0 mask when dx==0.
    plan = []                                     # plan[p] = [(t, shift, colmask)]
    for py in (0, 1):
        for px in (0, 1):
            taps = []
            for dy in ((1,) if py == 0 else (0, 2)):
                for dx in ((1,) if px == 0 else (0, 2)):
                    t = 3 * dy + dx
                    shift = (Wo if dy == 0 else 0) + (1 if dx == 0 else 0)
                    taps.append((t, shift, dx == 0))
            plan.append(taps)

    def kernel(xph_ref, cm_ref, w1_ref, b1_ref, w2_ref, wd_ref, bd_ref,
               o_ref, h2_ref):
        """One image per grid step.

        xph_ref : (4, Cin, n)       stride-2 phase planes of x
        cm_ref  : (1, n)            col-0 boundary mask (f32 0/1)
        w1_ref  : (width, Cin)      conv1 weight, BN1 scale folded
        b1_ref  : (width, 1)        folded BN1 bias (f32)
        w2_ref  : (width, 9*width)  conv2 weights, [co, t*width + ci]
        wd_ref  : (Cout, Cin)       downsample 1x1 weight, BN scale folded
        bd_ref  : (Cout, 1)         folded downsample BN bias (f32)
        o_ref   : (Cout, n)
        h2_ref  : (9*width, n)      VMEM scratch: restriped conv2 input
        """
        f32 = jnp.float32
        w1k = w1_ref[...]
        # Hoisted broadcasts (JAX does not CSE broadcast_in_dim in the
        # statically unrolled phase/tap loops).
        b1b = jnp.broadcast_to(b1_ref[...], (width, n))
        cm = jnp.broadcast_to(cm_ref[...], (width, n))

        # conv1 (+BN1+ReLU) once per phase; emit all conv2 taps that use it so
        # only one (width, n) f32 plane is live at a time.
        for p in range(4):
            h = jnp.dot(w1k, xph_ref[p], preferred_element_type=f32)
            h = jnp.maximum(h + b1b, 0.0)
            for (t, s, need_cm) in plan[p]:
                v = h
                if s:                           # zero-filled lane shift by s
                    v = jnp.concatenate(
                        [jnp.zeros((width, s), f32), v[:, :n - s]], axis=1)
                if need_cm:                     # conv2 left-padding boundary
                    v = v * cm
                h2_ref[pl.ds(t * width, width), :] = v.astype(h2_ref.dtype)

        # conv2 as ONE big-K matmul (K = 9*width), then ReLU.
        acc = jnp.dot(w2_ref[...], h2_ref[...], preferred_element_type=f32)
        acc = jnp.maximum(acc, 0.0)

        # downsample branch: 1x1 stride-2 conv + folded BN (phase 0 == x[:, ::2, ::2]).
        d = jnp.dot(wd_ref[...], xph_ref[0], preferred_element_type=f32) + bd_ref[...]

        # residual add + final ReLU, lane-dense store.
        o_ref[...] = jnp.maximum(acc + d, 0.0).astype(o_ref.dtype)

    out = pl.pallas_call(
        kernel,
        out_shape=jax.ShapeDtypeStruct((B, Cout, n), out_dtype),
        grid_spec=pltpu.PrefetchScalarGridSpec(
            num_scalar_prefetch=0,
            grid=(B,),
            in_specs=[
                pl.BlockSpec((None, 4, Cin, n), lambda b: (b, 0, 0, 0)),
                pl.BlockSpec((1, n), lambda b: (0, 0)),
                pl.BlockSpec((width, Cin), lambda b: (0, 0)),
                pl.BlockSpec((width, 1), lambda b: (0, 0)),
                pl.BlockSpec((width, 9 * width), lambda b: (0, 0)),
                pl.BlockSpec((Cout, Cin), lambda b: (0, 0)),
                pl.BlockSpec((Cout, 1), lambda b: (0, 0)),
            ],
            out_specs=pl.BlockSpec((None, Cout, n), lambda b: (b, 0, 0)),
            scratch_shapes=[pltpu.VMEM((9 * width, n), cd)],
        ),
        compiler_params=pltpu.CompilerParams(
            dimension_semantics=("parallel",)),
    )(xph, cmask, w1, b1c, w2, wd, bdc)

    # (B, Cout, Ho*Wo) -> (B, Cout, Ho, Wo): contiguous reshape, no transpose.
    return out.reshape(B, Cout, Ho, Wo)


# ----------------------------- reference (pure JAX) --------------------------

def reference_forward(x, params, eps=1e-5):
    def bn(h, g, b, m, v):
        g, b, m, v = (t[None, :, None, None] for t in (g, b, m, v))
        return (h - m) / jnp.sqrt(v + eps) * g + b

    conv = functools.partial(jax.lax.conv_general_dilated,
                             dimension_numbers=("NCHW", "OIHW", "NCHW"),
                             precision=jax.lax.Precision.HIGHEST)
    xd = conv(x, params["down_w"], window_strides=(2, 2), padding="VALID")
    xd = bn(xd, params["down_g"], params["down_b"],
            params["down_m"], params["down_v"])
    h = conv(x, params["conv1_w"], window_strides=(1, 1), padding="VALID")
    h = bn(h, params["bn1_g"], params["bn1_b"],
           params["bn1_m"], params["bn1_v"])
    h = jax.nn.relu(h)
    h = conv(h, params["conv2_w"], window_strides=(2, 2),
             padding=((1, 1), (1, 1)))
    h = jax.nn.relu(h)
    return jax.nn.relu(h + xd)


# ----------------------------- main ------------------------------------------

if __name__ == "__main__":
    Cin, Cout, H, W, B = 4, 8, 16, 16, 2
    width = Cout                      # base_width=64 => width = out_channels
    key = jax.random.PRNGKey(0)
    ks = jax.random.split(key, 16)

    params = {
        "conv1_w": jax.random.normal(ks[0], (width, Cin, 1, 1), jnp.float32) * 0.3,
        "bn1_g":   1.0 + 0.1 * jax.random.normal(ks[1], (width,), jnp.float32),
        "bn1_b":   0.1 * jax.random.normal(ks[2], (width,), jnp.float32),
        "bn1_m":   0.1 * jax.random.normal(ks[3], (width,), jnp.float32),
        "bn1_v":   jax.random.uniform(ks[4], (width,), jnp.float32, 0.5, 1.5),
        "conv2_w": jax.random.normal(ks[5], (width, width, 3, 3), jnp.float32) * 0.2,
        "down_w":  jax.random.normal(ks[6], (Cout, Cin, 1, 1), jnp.float32) * 0.3,
        "down_g":  1.0 + 0.1 * jax.random.normal(ks[7], (Cout,), jnp.float32),
        "down_b":  0.1 * jax.random.normal(ks[8], (Cout,), jnp.float32),
        "down_m":  0.1 * jax.random.normal(ks[9], (Cout,), jnp.float32),
        "down_v":  jax.random.uniform(ks[10], (Cout,), jnp.float32, 0.5, 1.5),
    }

    x = jax.random.normal(ks[11], (B, Cin, H, W), jnp.float32)
    ref = reference_forward(x, params)

    fwd = jax.jit(encoder_bottleneck_forward,
                  static_argnames=("compute_dtype", "out_dtype"))

    # f32 compute path: tight correctness check against the HIGHEST-precision
    # XLA reference.
    out32 = jax.block_until_ready(fwd(x, params, compute_dtype=jnp.float32))
    assert out32.shape == ref.shape == (B, Cout, H // 2, W // 2), out32.shape
    if not bool(jnp.allclose(out32, ref, rtol=2e-3, atol=2e-3)):
        raise AssertionError(
            f"f32 kernel/reference mismatch, max abs err = "
            f"{float(jnp.max(jnp.abs(out32 - ref)))}")

    # bf16 MXU-operand path (performance default): looser tolerance.
    out16 = jax.block_until_ready(fwd(x, params, compute_dtype=jnp.bfloat16))
    if not bool(jnp.allclose(out16, ref, rtol=5e-2, atol=5e-2)):
        raise AssertionError(
            f"bf16 kernel/reference mismatch, max abs err = "
            f"{float(jnp.max(jnp.abs(out16 - ref)))}")

    print("KERNEL_OK")
</pallas_src>

<mosaic_0001>
module attributes {stable_mosaic.version = 11 : i64} {
  func.func @kernel(%arg0: i32, %arg1: memref<1x4x4x64xf32, #tpu.memory_space<vmem>>, %arg2: memref<1x64xf32, #tpu.memory_space<vmem>>, %arg3: memref<8x4xf32, #tpu.memory_space<vmem>>, %arg4: memref<8x1xf32, #tpu.memory_space<vmem>>, %arg5: memref<8x72xf32, #tpu.memory_space<vmem>>, %arg6: memref<8x4xf32, #tpu.memory_space<vmem>>, %arg7: memref<8x1xf32, #tpu.memory_space<vmem>>, %arg8: memref<1x8x64xf32, #tpu.memory_space<vmem>>, %arg9: memref<72x64xf32, #tpu.memory_space<vmem>>) attributes {dimension_semantics = [#tpu.dimension_semantics<parallel>], iteration_bounds = array<i64: 2>, scalar_prefetch = 0 : i64, scratch_operands = 1 : i64, tpu.core_type = #tpu.core_type<tc>, window_params = [{transform_indices = @transform_0, window_bounds = array<i64: 1, 4, 4, 64>}, {pipeline_mode = #tpu.pipeline_mode<synchronous>, transform_indices = @transform_1, window_bounds = array<i64: 1, 64>}, {pipeline_mode = #tpu.pipeline_mode<synchronous>, transform_indices = @transform_2, window_bounds = array<i64: 8, 4>}, {pipeline_mode = #tpu.pipeline_mode<synchronous>, transform_indices = @transform_3, window_bounds = array<i64: 8, 1>}, {pipeline_mode = #tpu.pipeline_mode<synchronous>, transform_indices = @transform_4, window_bounds = array<i64: 8, 72>}, {pipeline_mode = #tpu.pipeline_mode<synchronous>, transform_indices = @transform_5, window_bounds = array<i64: 8, 4>}, {pipeline_mode = #tpu.pipeline_mode<synchronous>, transform_indices = @transform_6, window_bounds = array<i64: 8, 1>}, {transform_indices = @transform_7, window_bounds = array<i64: 1, 8, 64>}]} {
    %c0 = arith.constant 0 : index
    %c0_0 = arith.constant 0 : index
    %0 = vector.load %arg3[%c0, %c0_0] : memref<8x4xf32, #tpu.memory_space<vmem>>, vector<8x4xf32>
    %c0_1 = arith.constant 0 : index
    %c0_2 = arith.constant 0 : index
    %1 = vector.load %arg4[%c0_1, %c0_2] : memref<8x1xf32, #tpu.memory_space<vmem>>, vector<8x1xf32>
    %2 = vector.shape_cast %1 : vector<8x1xf32> to vector<8x1xf32>
    %3 = vector.broadcast %2 : vector<8x1xf32> to vector<8x64xf32>
    %c0_3 = arith.constant 0 : index
    %c0_4 = arith.constant 0 : index
    %4 = vector.load %arg2[%c0_3, %c0_4] : memref<1x64xf32, #tpu.memory_space<vmem>>, vector<1x64xf32>
    %5 = vector.shape_cast %4 : vector<1x64xf32> to vector<1x64xf32>
    %6 = vector.broadcast %5 : vector<1x64xf32> to vector<8x64xf32>
    %c0_5 = arith.constant 0 : index
    %c0_6 = arith.constant 0 : index
    %c0_7 = arith.constant 0 : index
    %c0_8 = arith.constant 0 : index
    %7 = vector.load %arg1[%c0_5, %c0_6, %c0_7, %c0_8] : memref<1x4x4x64xf32, #tpu.memory_space<vmem>>, vector<1x1x4x64xf32>
    %8 = vector.shape_cast %7 : vector<1x1x4x64xf32> to vector<4x64xf32>
    %cst = arith.constant dense<0.000000e+00> : vector<8x64xf32>
    %9 = tpu.matmul %0, %8, %cst {dimension_numbers = #tpu.dot_dimension_numbers<[1], [0], [0], [1], [0, 0, 1, 1], [], []>} : vector<8x4xf32>, vector<4x64xf32>, vector<8x64xf32> -> vector<8x64xf32>
    %10 = arith.addf %9, %3 : vector<8x64xf32>
    %cst_9 = arith.constant 0.000000e+00 : f32
    %11 = vector.broadcast %cst_9 : f32 to vector<8x64xf32>
    %12 = arith.maximumf %10, %11 : vector<8x64xf32>
    %c32 = arith.constant 32 : index
    %c0_10 = arith.constant 0 : index
    %13 = vector.load %arg9[%c32, %c0_10] : memref<72x64xf32, #tpu.memory_space<vmem>>, vector<8x64xf32>
    tpu.vector_store %arg9[%c32, %c0_10], %12 {strides = array<i32>} : memref<72x64xf32, #tpu.memory_space<vmem>>, vector<8x64xf32>,
    %c0_11 = arith.constant 0 : index
    %c1 = arith.constant 1 : index
    %c0_12 = arith.constant 0 : index
    %c0_13 = arith.constant 0 : index
    %14 = vector.load %arg1[%c0_11, %c1, %c0_12, %c0_13] : memref<1x4x4x64xf32, #tpu.memory_space<vmem>>, vector<1x1x4x64xf32>
    %15 = vector.shape_cast %14 : vector<1x1x4x64xf32> to vector<4x64xf32>
    %cst_14 = arith.constant dense<0.000000e+00> : vector<8x64xf32>
    %16 = tpu.matmul %0, %15, %cst_14 {dimension_numbers = #tpu.dot_dimension_numbers<[1], [0], [0], [1], [0, 0, 1, 1], [], []>} : vector<8x4xf32>, vector<4x64xf32>, vector<8x64xf32> -> vector<8x64xf32>
    %17 = arith.addf %16, %3 : vector<8x64xf32>
    %cst_15 = arith.constant 0.000000e+00 : f32
    %18 = vector.broadcast %cst_15 : f32 to vector<8x64xf32>
    %19 = arith.maximumf %17, %18 : vector<8x64xf32>
    %cst_16 = arith.constant 0.000000e+00 : f32
    %20 = vector.broadcast %cst_16 : f32 to vector<8x1xf32>
    %21 = vector.extract_strided_slice %19 {offsets = [0, 0], sizes = [8, 63], strides = [1, 1]} : vector<8x64xf32> to vector<8x63xf32>
    %22 = tpu.concatenate %20, %21 in 1 : vector<8x1xf32>, vector<8x63xf32> -> vector<8x64xf32>
    %23 = arith.mulf %22, %6 : vector<8x64xf32>
    %c24 = arith.constant 24 : index
    %c0_17 = arith.constant 0 : index
    %24 = vector.load %arg9[%c24, %c0_17] : memref<72x64xf32, #tpu.memory_space<vmem>>, vector<8x64xf32>
    tpu.vector_store %arg9[%c24, %c0_17], %23 {strides = array<i32>} : memref<72x64xf32, #tpu.memory_space<vmem>>, vector<8x64xf32>,
    %c40 = arith.constant 40 : index
    %c0_18 = arith.constant 0 : index
    %25 = vector.load %arg9[%c40, %c0_18] : memref<72x64xf32, #tpu.memory_space<vmem>>, vector<8x64xf32>
    tpu.vector_store %arg9[%c40, %c0_18], %19 {strides = array<i32>} : memref<72x64xf32, #tpu.memory_space<vmem>>, vector<8x64xf32>,
    %c0_19 = arith.constant 0 : index
    %c2 = arith.constant 2 : index
    %c0_20 = arith.constant 0 : index
    %c0_21 = arith.constant 0 : index
    %26 = vector.load %arg1[%c0_19, %c2, %c0_20, %c0_21] : memref<1x4x4x64xf32, #tpu.memory_space<vmem>>, vector<1x1x4x64xf32>
    %27 = vector.shape_cast %26 : vector<1x1x4x64xf32> to vector<4x64xf32>
    %cst_22 = arith.constant dense<0.000000e+00> : vector<8x64xf32>
    %28 = tpu.matmul %0, %27, %cst_22 {dimension_numbers = #tpu.dot_dimension_numbers<[1], [0], [0], [1], [0, 0, 1, 1], [], []>} : vector<8x4xf32>, vector<4x64xf32>, vector<8x64xf32> -> vector<8x64xf32>
    %29 = arith.addf %28, %3 : vector<8x64xf32>
    %cst_23 = arith.constant 0.000000e+00 : f32
    %30 = vector.broadcast %cst_23 : f32 to vector<8x64xf32>
    %31 = arith.maximumf %29, %30 : vector<8x64xf32>
    %cst_24 = arith.constant 0.000000e+00 : f32
    %32 = vector.broadcast %cst_24 : f32 to vector<8x8xf32>
    %33 = vector.extract_strided_slice %31 {offsets = [0, 0], sizes = [8, 56], strides = [1, 1]} : vector<8x64xf32> to vector<8x56xf32>
    %34 = tpu.concatenate %32, %33 in 1 : vector<8x8xf32>, vector<8x56xf32> -> vector<8x64xf32>
    %c8 = arith.constant 8 : index
    %c0_25 = arith.constant 0 : index
    %35 = vector.load %arg9[%c8, %c0_25] : memref<72x64xf32, #tpu.memory_space<vmem>>, vector<8x64xf32>
    tpu.vector_store %arg9[%c8, %c0_25], %34 {strides = array<i32>} : memref<72x64xf32, #tpu.memory_space<vmem>>, vector<8x64xf32>,
    %c56 = arith.constant 56 : index
    %c0_26 = arith.constant 0 : index
    %36 = vector.load %arg9[%c56, %c0_26] : memref<72x64xf32, #tpu.memory_space<vmem>>, vector<8x64xf32>
    tpu.vector_store %arg9[%c56, %c0_26], %31 {strides = array<i32>} : memref<72x64xf32, #tpu.memory_space<vmem>>, vector<8x64xf32>,
    %c0_27 = arith.constant 0 : index
    %c3 = arith.constant 3 : index
    %c0_28 = arith.constant 0 : index
    %c0_29 = arith.constant 0 : index
    %37 = vector.load %arg1[%c0_27, %c3, %c0_28, %c0_29] : memref<1x4x4x64xf32, #tpu.memory_space<vmem>>, vector<1x1x4x64xf32>
    %38 = vector.shape_cast %37 : vector<1x1x4x64xf32> to vector<4x64xf32>
    %cst_30 = arith.constant dense<0.000000e+00> : vector<8x64xf32>
    %39 = tpu.matmul %0, %38, %cst_30 {dimension_numbers = #tpu.dot_dimension_numbers<[1], [0], [0], [1], [0, 0, 1, 1], [], []>} : vector<8x4xf32>, vector<4x64xf32>, vector<8x64xf32> -> vector<8x64xf32>
    %40 = arith.addf %39, %3 : vector<8x64xf32>
    %cst_31 = arith.constant 0.000000e+00 : f32
    %41 = vector.broadcast %cst_31 : f32 to vector<8x64xf32>
    %42 = arith.maximumf %40, %41 : vector<8x64xf32>
    %cst_32 = arith.constant 0.000000e+00 : f32
    %43 = vector.broadcast %cst_32 : f32 to vector<8x9xf32>
    %44 = vector.extract_strided_slice %42 {offsets = [0, 0], sizes = [8, 55], strides = [1, 1]} : vector<8x64xf32> to vector<8x55xf32>
    %45 = tpu.concatenate %43, %44 in 1 : vector<8x9xf32>, vector<8x55xf32> -> vector<8x64xf32>
    %46 = arith.mulf %45, %6 : vector<8x64xf32>
    %c0_33 = arith.constant 0 : index
    %c0_34 = arith.constant 0 : index
    %47 = vector.load %arg9[%c0_33, %c0_34] : memref<72x64xf32, #tpu.memory_space<vmem>>, vector<8x64xf32>
    tpu.vector_store %arg9[%c0_33, %c0_34], %46 {strides = array<i32>} : memref<72x64xf32, #tpu.memory_space<vmem>>, vector<8x64xf32>,
    %cst_35 = arith.constant 0.000000e+00 : f32
    %48 = vector.broadcast %cst_35 : f32 to vector<8x8xf32>
    %49 = vector.extract_strided_slice %42 {offsets = [0, 0], sizes = [8, 56], strides = [1, 1]} : vector<8x64xf32> to vector<8x56xf32>
    %50 = tpu.concatenate %48, %49 in 1 : vector<8x8xf32>, vector<8x56xf32> -> vector<8x64xf32>
    %c16 = arith.constant 16 : index
    %c0_36 = arith.constant 0 : index
    %51 = vector.load %arg9[%c16, %c0_36] : memref<72x64xf32, #tpu.memory_space<vmem>>, vector<8x64xf32>
    tpu.vector_store %arg9[%c16, %c0_36], %50 {strides = array<i32>} : memref<72x64xf32, #tpu.memory_space<vmem>>, vector<8x64xf32>,
    %cst_37 = arith.constant 0.000000e+00 : f32
    %52 = vector.broadcast %cst_37 : f32 to vector<8x1xf32>
    %53 = vector.extract_strided_slice %42 {offsets = [0, 0], sizes = [8, 63], strides = [1, 1]} : vector<8x64xf32> to vector<8x63xf32>
    %54 = tpu.concatenate %52, %53 in 1 : vector<8x1xf32>, vector<8x63xf32> -> vector<8x64xf32>
    %55 = arith.mulf %54, %6 : vector<8x64xf32>
    %c48 = arith.constant 48 : index
    %c0_38 = arith.constant 0 : index
    %56 = vector.load %arg9[%c48, %c0_38] : memref<72x64xf32, #tpu.memory_space<vmem>>, vector<8x64xf32>
    tpu.vector_store %arg9[%c48, %c0_38], %55 {strides = array<i32>} : memref<72x64xf32, #tpu.memory_space<vmem>>, vector<8x64xf32>,
    %c64 = arith.constant 64 : index
    %c0_39 = arith.constant 0 : index
    %57 = vector.load %arg9[%c64, %c0_39] : memref<72x64xf32, #tpu.memory_space<vmem>>, vector<8x64xf32>
    tpu.vector_store %arg9[%c64, %c0_39], %42 {strides = array<i32>} : memref<72x64xf32, #tpu.memory_space<vmem>>, vector<8x64xf32>,
    %c0_40 = arith.constant 0 : index
    %c0_41 = arith.constant 0 : index
    %58 = vector.load %arg5[%c0_40, %c0_41] : memref<8x72xf32, #tpu.memory_space<vmem>>, vector<8x72xf32>
    %c0_42 = arith.constant 0 : index
    %c0_43 = arith.constant 0 : index
    %59 = vector.load %arg9[%c0_42, %c0_43] : memref<72x64xf32, #tpu.memory_space<vmem>>, vector<72x64xf32>
    %cst_44 = arith.constant dense<0.000000e+00> : vector<8x64xf32>
    %60 = tpu.matmul %58, %59, %cst_44 {dimension_numbers = #tpu.dot_dimension_numbers<[1], [0], [0], [1], [0, 0, 1, 1], [], []>} : vector<8x72xf32>, vector<72x64xf32>, vector<8x64xf32> -> vector<8x64xf32>
    %cst_45 = arith.constant 0.000000e+00 : f32
    %61 = vector.broadcast %cst_45 : f32 to vector<8x64xf32>
    %62 = arith.maximumf %60, %61 : vector<8x64xf32>
    %c0_46 = arith.constant 0 : index
    %c0_47 = arith.constant 0 : index
    %63 = vector.load %arg6[%c0_46, %c0_47] : memref<8x4xf32, #tpu.memory_space<vmem>>, vector<8x4xf32>
    %c0_48 = arith.constant 0 : index
    %c0_49 = arith.constant 0 : index
    %c0_50 = arith.constant 0 : index
    %c0_51 = arith.constant 0 : index
    %64 = vector.load %arg1[%c0_48, %c0_49, %c0_50, %c0_51] : memref<1x4x4x64xf32, #tpu.memory_space<vmem>>, vector<1x1x4x64xf32>
    %65 = vector.shape_cast %64 : vector<1x1x4x64xf32> to vector<4x64xf32>
    %cst_52 = arith.constant dense<0.000000e+00> : vector<8x64xf32>
    %66 = tpu.matmul %63, %65, %cst_52 {dimension_numbers = #tpu.dot_dimension_numbers<[1], [0], [0], [1], [0, 0, 1, 1], [], []>} : vector<8x4xf32>, vector<4x64xf32>, vector<8x64xf32> -> vector<8x64xf32>
    %c0_53 = arith.constant 0 : index
    %c0_54 = arith.constant 0 : index
    %67 = vector.load %arg7[%c0_53, %c0_54] : memref<8x1xf32, #tpu.memory_space<vmem>>, vector<8x1xf32>
    %68 = vector.broadcast %67 : vector<8x1xf32> to vector<8x64xf32>
    %69 = arith.addf %66, %68 : vector<8x64xf32>
    %70 = arith.addf %62, %69 : vector<8x64xf32>
    %cst_55 = arith.constant 0.000000e+00 : f32
    %71 = vector.broadcast %cst_55 : f32 to vector<8x64xf32>
    %72 = arith.maximumf %70, %71 : vector<8x64xf32>
    %c0_56 = arith.constant 0 : index
    %c0_57 = arith.constant 0 : index
    %c0_58 = arith.constant 0 : index
    %73 = vector.load %arg8[%c0_56, %c0_57, %c0_58] : memref<1x8x64xf32, #tpu.memory_space<vmem>>, vector<1x8x64xf32>
    %74 = vector.shape_cast %73 : vector<1x8x64xf32> to vector<8x64xf32>
    %75 = vector.shape_cast %72 : vector<8x64xf32> to vector<1x8x64xf32>
    tpu.vector_store %arg8[%c0_56, %c0_57, %c0_58], %75 {strides = array<i32>} : memref<1x8x64xf32, #tpu.memory_space<vmem>>, vector<1x8x64xf32>,
    return
  }
  func.func @transform_0(%arg0: i32) -> (i32, i32, i32, i32) {
    %c0_i32 = arith.constant 0 : i32
    %c0_i32_0 = arith.constant 0 : i32
    %c0_i32_1 = arith.constant 0 : i32
    %c0_i32_2 = arith.constant 0 : i32
    return %arg0, %c0_i32, %c0_i32_0, %c0_i32_1 : i32, i32, i32, i32
  }
  func.func @transform_1(%arg0: i32) -> (i32, i32) {
    %c0_i32 = arith.constant 0 : i32
    %c0_i32_0 = arith.constant 0 : i32
    %c0_i32_1 = arith.constant 0 : i32
    return %c0_i32, %c0_i32_0 : i32, i32
  }
  func.func @transform_2(%arg0: i32) -> (i32, i32) {
    %c0_i32 = arith.constant 0 : i32
    %c0_i32_0 = arith.constant 0 : i32
    %c0_i32_1 = arith.constant 0 : i32
    return %c0_i32, %c0_i32_0 : i32, i32
  }
  func.func @transform_3(%arg0: i32) -> (i32, i32) {
    %c0_i32 = arith.constant 0 : i32
    %c0_i32_0 = arith.constant 0 : i32
    %c0_i32_1 = arith.constant 0 : i32
    return %c0_i32, %c0_i32_0 : i32, i32
  }
  func.func @transform_4(%arg0: i32) -> (i32, i32) {
    %c0_i32 = arith.constant 0 : i32
    %c0_i32_0 = arith.constant 0 : i32
    %c0_i32_1 = arith.constant 0 : i32
    return %c0_i32, %c0_i32_0 : i32, i32
  }
  func.func @transform_5(%arg0: i32) -> (i32, i32) {
    %c0_i32 = arith.constant 0 : i32
    %c0_i32_0 = arith.constant 0 : i32
    %c0_i32_1 = arith.constant 0 : i32
    return %c0_i32, %c0_i32_0 : i32, i32
  }
  func.func @transform_6(%arg0: i32) -> (i32, i32) {
    %c0_i32 = arith.constant 0 : i32
    %c0_i32_0 = arith.constant 0 : i32
    %c0_i32_1 = arith.constant 0 : i32
    return %c0_i32, %c0_i32_0 : i32, i32
  }
  func.func @transform_7(%arg0: i32) -> (i32, i32, i32) {
    %c0_i32 = arith.constant 0 : i32
    %c0_i32_0 = arith.constant 0 : i32
    %c0_i32_1 = arith.constant 0 : i32
    return %arg0, %c0_i32, %c0_i32_0 : i32, i32, i32
  }
}

</mosaic_0001>

<bundles_post_ra>
// kernel: encoder_bottleneck_forward.1
= control target key start
LH: loop header
LB: loop body
LE: loop exit
PB: predicated region body
PF: predicated region fallthrough
CT: control target
= control target key end

     0   :  { %s651_s24 = smov 0   ;;  %s712_s0 = inlined_call_operand.vmem [shape: f32[2,4,4,64], index: 0, kind: input, shape index: {}]   ;;  %s713_s1 = inlined_call_operand.vmem [shape: f32[1,64], index: 1, kind: input, shape index: {}]   ;;  %s714_s2 = inlined_call_operand.vmem [shape: f32[8,4], index: 2, kind: input, shape index: {}]   ;;  %s715_s3 = inlined_call_operand.vmem [shape: f32[8,1], index: 3, kind: input, shape index: {}]   ;;  %s716_s4 = inlined_call_operand.vmem [shape: f32[8,72], index: 4, kind: input, shape index: {}]   ;;  %s717_s5 = inlined_call_operand.vmem [shape: f32[8,4], index: 5, kind: input, shape index: {}]   ;;  %s718_s6 = inlined_call_operand.vmem [shape: f32[8,1], index: 6, kind: input, shape index: {}]   ;;  %s719_s7 = inlined_call_operand.vmem [shape: f32[2,8,64], index: 7, kind: output, shape index: {}]  }
   0x1 LB: > { %s560_s25 = sadd.s32 4294967295, %s605_s24   ;;  %p564_p0 = scmp.ge.s32.totalorder %s605_s24, 1  ;;  %s605_s24 = sphi %s651_s24, %s17_s24  }
   0x2   : > { %p237_p1 = scmp.lt.s32.totalorder %s605_s24, 3 }
   0x4   : > { %p238_p2 = pnand %p564_p0, %p237_p1 }
   0x5   : > { %p268_p3 = scmp.lt.s32.totalorder (!%p238_p2), %s560_s25, 1  ;;  %s608_s13 = smov (!%p238_p2), 1  }
   0x6   : > { %241 = sbr.rel (%p238_p2) target bundleno = 425 (0x1a9), region = 48  ;;  %s609_s14 = smov (!%p238_p2), 8  }
   0x7   : > { %s610_s17 = smov (!%p238_p2), 9  }
   0xb   : > { %v278_v0 = vld [vmem:[%s715_s3] sm:$0xff]  ;;  %v607_v1 = vmov 0   ;;  %s721_s25 = smov (!%p268_p3, %s560_s25), 1  ;;  %vm293_vm0 = vcmask 1043456   ;;  %vm289_vm1 = vcmask 31744   ;;  %vm318_vm2 = vcmask 523264  }
   0xc   : > { %597 = vset.pattern.permute.xlu0 %v607_v1  ;;  %s584_s28 = sshll.u32 %s721_s25, 4  ;;  %v277_v2 = vld [vmem:[%s714_s2] sm:$0xff]  ;;  %vm385_vm3 = vcmask 64512   ;;  %vm419_vm4 = vcmask 72704   ;;  %vm350_vm5 = vcmask 7168   ;;  %vm445_vm6 = vcmask 588800  }
   0xd   : > { %281 = vperm.xlu0 %597, %v278_v0   ;;  %s272_s8 = scalar_lea.vmem %s712_s0, %s584_s28  ;;  %v470_v8 = vld [vmem:[%s717_s5] sm:$0xff]  ;;  %s567_s22 = sshll.u32 %s721_s25, 3 }
   0xe   : > { %v288_v3 = vld [vmem:[%s272_s8] sm:$0xf]  ;;  %v570_v4 = vld [vmem:[%s272_s8 + $0x4] sm:$0xf]  ;;  %v576_v5 = vld [vmem:[%s272_s8 + $0xc] sm:$0xf]  ;;  %s276_s27 = scalar_lea.vmem %s719_s7, %s567_s22 }
   0xf   : > { %568 = vmatpush.msk.msra.mxu2 %vm293_vm0, %v288_v3  ;;  %571 = vmatpush.msk.msra.mxu1 %vm293_vm0, %v570_v4  ;;  %v573_v6 = vld [vmem:[%s272_s8 + $0x8] sm:$0xf]  ;;  %v471_v7 = vld [vmem:[%s272_s8] sm:$0xf] }
  0x10   : > { %577 = vmatpush.msk.msra.mxu3 %vm293_vm0, %v576_v5  ;;  %569 = vmatmul.msk.f32.vlgmr.msra.gmra.mxu2 %vm289_vm1, %v277_v2  ;;  %v472_v22 = vld [vmem:[%s718_s6] sm:$0xff] }
  0x11   : > { %572 = vmatmul.msk.f32.vlgmr.msra.gmra.mxu1 %vm289_vm1, %v277_v2  ;;  %578 = vmatmul.msk.f32.vlgmr.msra.gmra.mxu3 %vm289_vm1, %v277_v2  ;;  %v598_v27 = vld [vmem:[%s713_s1] ss:$0 sm:$0xff] }
  0x12   : > { %574 = vmatpush.msk.msrb.mxu2 %vm293_vm0, %v573_v6  ;;  %580 = vmatpush.msk.msrb.mxu1 %vm293_vm0, %v471_v7  ;;  %v435_v45 = vld [vmem:[%s716_s4] sm:$0xff] }
  0x18   : > { %575 = vmatmul.msk.f32.vlgmr.msrb.gmra.mxu2 %vm289_vm1, %v277_v2 }
  0x19   : > { %581 = vmatmul.msk.f32.vlgmr.msrb.gmra.mxu1 %vm289_vm1, %v470_v8 }
  0x7f   : > { %v282_v9 = vpop.permute.xlu0 %281 }
  0x8e   : > { %v342_v10 = vpop.f32.mrf.mxu1 }
  0x8f   : > { %v343_v11 = vadd.f32 %v342_v10, %v282_v9 }
  0x91   : > { %v345_v12 = vmax.f32 %v343_v11, 0.0 }
  0x93   : > { %354 = vst.msk [vmem:[#allocation2 + $0x28] sm:$0xff] %vm318_vm2, %v345_v12  ;;  %347 = vrot.lane.b32.xlu1 %v345_v12, %s608_s13  ;;  %v314_v13 = vpop.f32.mrf.mxu2 }
  0x94   : > { %v315_v14 = vadd.f32 %v314_v13, %v282_v9  ;;  %v411_v15 = vpop.f32.mrf.mxu3 }
  0x95   : > { %v412_v16 = vadd.f32 %v411_v15, %v282_v9 }
  0x96   : > { %v317_v17 = vmax.f32 %v315_v14, 0.0  ;;  %v501_v48 = vpop.f32.mrf.mxu1 }
  0x97   : > { %v414_v18 = vmax.f32 %v412_v16, 0.0 }
  0x98   : > { %319 = vst.msk [vmem:[#allocation2 + $0x20] sm:$0xff] %vm318_vm2, %v317_v17 }
  0x99   : > { %434 = vst.msk [vmem:[#allocation2 + $0x40] sm:$0xff] %vm318_vm2, %v414_v18  ;;  %428 = vrot.lane.b32.xlu0 %v414_v18, %s608_s13 }
  0x9a   : > { %v441_v40 = vld [vmem:[#allocation2 + $0x28] sm:$0xff] }
  0x9b   : > { %423 = vrot.lane.b32.xlu1 %v414_v18, %s609_s14  ;;  %v377_v19 = vpop.f32.mrf.mxu2 }
  0x9c   : > { %v378_v20 = vadd.f32 %v377_v19, %v282_v9 }
  0x9e   : > { %v380_v21 = vmax.f32 %v378_v20, 0.0 }
  0x9f   : > { %v440_v41 = vld [vmem:[#allocation2 + $0x20] sm:$0xff] }
  0xa0   : > { %388 = vst.msk [vmem:[#allocation2 + $0x38] sm:$0xff] %vm318_vm2, %v380_v21  ;;  %v444_v23 = vld [vmem:[#allocation2 + $0x40] sm:$0xff]  ;;  %382 = vrot.lane.b32.xlu2 %v380_v21, %s609_s14 }
  0xa1   : > { %475 = vperm.xlu0 %597, %v472_v22   ;;  %456 = vmatpush.msra.mxu0 %v444_v23 }
  0xa7   : > { %v443_v24 = vld [vmem:[#allocation2 + $0x38] sm:$0xff] }
  0xa8   : > { %416 = vrot.lane.b32.xlu2 %v414_v18, %s610_s17  ;;  %457 = vmatpush.msra.mxu0 %v443_v24 }
  0xfa   : > { %v383_v25 = vpop.permute.xlu2 %382 }
  0xfb   : > { %v386_v26 = vsel %vm385_vm3, 0.0, %v383_v25 }
  0xfc   : > { %387 = vst.msk [vmem:[#allocation2 + $0x8] sm:$0xff] %vm318_vm2, %v386_v26 }
 0x102   : > { %v417_v28 = vpop.permute.xlu2 %416 }
 0x103   : > { %v420_v29 = vsel %vm419_vm4, 0.0, %v417_v28  ;;  %v437_v44 = vld [vmem:[#allocation2 + $0x8] sm:$0xff] }
 0x104   : > { %v421_v30 = vmul.f32 %v598_v27, %v420_v29 }
 0x105   : > { %v348_v31 = vpop.permute.xlu1 %347 }
 0x106   : > { %422 = vst.msk [vmem:[#allocation2] sm:$0xff] %vm318_vm2, %v421_v30  ;;  %v351_v32 = vsel %vm350_vm5, 0.0, %v348_v31 }
 0x107   : > { %v352_v33 = vmul.f32 %v598_v27, %v351_v32 }
 0x109   : > { %353 = vst.msk [vmem:[#allocation2 + $0x18] sm:$0xff] %vm318_vm2, %v352_v33 }
 0x10b   : > { %v429_v34 = vpop.permute.xlu0 %428 }
 0x10c   : > { %v431_v35 = vsel %vm350_vm5, 0.0, %v429_v34 }
 0x10d   : > { %v432_v36 = vmul.f32 %v598_v27, %v431_v35  ;;  %v424_v37 = vpop.permute.xlu1 %423  ;;  %v436_v46 = vld [vmem:[#allocation2] sm:$0xff] }
 0x10e   : > { %v426_v38 = vsel %vm385_vm3, 0.0, %v424_v37 }
 0x10f   : > { %433 = vst.msk [vmem:[#allocation2 + $0x30] sm:$0xff] %vm318_vm2, %v432_v36 }
 0x110   : > { %427 = vst.msk [vmem:[#allocation2 + $0x10] sm:$0xff] %vm318_vm2, %v426_v38  ;;  %v439_v42 = vld [vmem:[#allocation2 + $0x18] sm:$0xff] }
 0x113   : > { %v476_v47 = vpop.permute.xlu0 %475 }
 0x114   : > { %v502_v50 = vadd.f32 %v501_v48, %v476_v47 }
 0x116   : > { %v442_v39 = vld [vmem:[#allocation2 + $0x30] sm:$0xff] }
 0x117   : > { %458 = vmatpush.msra.mxu0 %v442_v39  ;;  %v438_v43 = vld [vmem:[#allocation2 + $0x10] sm:$0xff] }
 0x119   : > { %459 = vmatpush.msra.mxu0 %v441_v40 }
 0x11b   : > { %460 = vmatpush.msra.mxu0 %v440_v41 }
 0x11d   : > { %461 = vmatpush.msra.mxu0 %v439_v42 }
 0x11f   : > { %462 = vmatpush.msra.mxu0 %v438_v43 }
 0x121   : > { %463 = vmatpush.msra.mxu0 %v437_v44 }
 0x123   : > { %464 = vmatpush.msra.mxu0 %v436_v46 }
 0x124   : > { %579 = vmatmul.msk.f32.vlgmr.msra.gmra.mxu0 %vm445_vm6, %v435_v45 }
 0x1a1   : > { %v466_v49 = vpop.f32.mrf.mxu0 }
 0x1a2   : > { %v469_v51 = vmax.f32 %v466_v49, 0.0 }
 0x1a4   : > { %v504_v52 = vadd.f32 %v502_v50, %v469_v51 }
 0x1a6   : > { %v505_v53 = vmax.f32 %v504_v52, 0.0 }
 0x1a8   : > { %506 = vst.msk [vmem:[%s276_s27] sm:$0xff] %vm318_vm2, %v505_v53 }
 0x1a9 PF: > { %s17_s24 = sadd.s32 1, %s605_s24  }
 0x1aa   : > { %p14_p4 = scmp.ge.s32.totalorder %s17_s24, 4  }
 0x1ac   :  { %16 = sbr.rel (!%p14_p4) target bundleno = 1 (0x1), region = 81 }

</bundles_post_ra>
